<compile_context>
chip_gen: v7x
topology: tpu7x:2x2x1
jax: 0.10.0
libtpu: 0.0.40
codegen_flags: <defaults>
</compile_context>

<pallas_src>
import functools

import jax
import jax.numpy as jnp
from jax import lax
from jax.experimental import pallas as pl
from jax.experimental.pallas import tpu as pltpu


_BN_EPS = 1e-5
_VMEM = pl.BlockSpec(memory_space=pltpu.MemorySpace.VMEM)


# ----------------------------------------------------------------------------
# Pallas kernels (whole-array single block; shapes are tiny and fit VMEM easily)
# ----------------------------------------------------------------------------
def _conv_bn_relu_kernel(a_ref, w_ref, b_ref, g_ref, beta_ref, o_ref, *, eps):
    """o = relu(batchnorm(w @ a + b)).  a: (K, M) bf16, w: (Cout, K) bf16."""
    y = jnp.dot(w_ref[...], a_ref[...], preferred_element_type=jnp.float32)  # (Cout, M)
    y = y + b_ref[...]                                   # (Cout, 1) broadcast
    mean = jnp.mean(y, axis=1, keepdims=True)            # batch-stat BN (training-mode fwd)
    var = jnp.mean(jnp.square(y - mean), axis=1, keepdims=True)
    y = (y - mean) * lax.rsqrt(var + eps) * g_ref[...] + beta_ref[...]
    o_ref[...] = jnp.maximum(y, 0.0).astype(o_ref.dtype)


def _conv_bn_add_relu_proj_kernel(a_ref, w_ref, b_ref, g_ref, beta_ref,
                                  xs_ref, w3_ref, b3_ref, o_ref, *, eps):
    """o = relu(batchnorm(w @ a + b) + (w3 @ xs + b3))   (1x1-conv projection skip)."""
    y = jnp.dot(w_ref[...], a_ref[...], preferred_element_type=jnp.float32) + b_ref[...]
    mean = jnp.mean(y, axis=1, keepdims=True)
    var = jnp.mean(jnp.square(y - mean), axis=1, keepdims=True)
    y = (y - mean) * lax.rsqrt(var + eps) * g_ref[...] + beta_ref[...]
    sk = jnp.dot(w3_ref[...], xs_ref[...], preferred_element_type=jnp.float32) + b3_ref[...]
    o_ref[...] = jnp.maximum(y + sk, 0.0).astype(o_ref.dtype)


def _conv_bn_add_relu_id_kernel(a_ref, w_ref, b_ref, g_ref, beta_ref,
                                x_ref, o_ref, *, eps):
    """o = relu(batchnorm(w @ a + b) + x)   (identity skip)."""
    y = jnp.dot(w_ref[...], a_ref[...], preferred_element_type=jnp.float32) + b_ref[...]
    mean = jnp.mean(y, axis=1, keepdims=True)
    var = jnp.mean(jnp.square(y - mean), axis=1, keepdims=True)
    y = (y - mean) * lax.rsqrt(var + eps) * g_ref[...] + beta_ref[...]
    o_ref[...] = jnp.maximum(y + x_ref[...].astype(jnp.float32), 0.0).astype(o_ref.dtype)


def conv_bn_relu(a, w, b, g, beta):
    Cout, M = w.shape[0], a.shape[1]
    return pl.pallas_call(
        functools.partial(_conv_bn_relu_kernel, eps=_BN_EPS),
        out_shape=jax.ShapeDtypeStruct((Cout, M), jnp.bfloat16),
        in_specs=[_VMEM] * 5,
        out_specs=_VMEM,
    )(a, w, b, g, beta)


def conv_bn_add_relu(a, w, b, g, beta, skip, w3=None, b3=None):
    Cout, M = w.shape[0], a.shape[1]
    if w3 is not None:
        kern = functools.partial(_conv_bn_add_relu_proj_kernel, eps=_BN_EPS)
        args = (a, w, b, g, beta, skip, w3, b3)
    else:
        kern = functools.partial(_conv_bn_add_relu_id_kernel, eps=_BN_EPS)
        args = (a, w, b, g, beta, skip)
    return pl.pallas_call(
        kern,
        out_shape=jax.ShapeDtypeStruct((Cout, M), jnp.float32),
        in_specs=[_VMEM] * len(args),
        out_specs=_VMEM,
    )(*args)


# ----------------------------------------------------------------------------
# Plain-JAX glue: im2col on channel-major (C, N, H, W) layout
# ----------------------------------------------------------------------------
def _im2col_cnhw(x_cnhw, ksize, pad, stride):
    """x: (C, N, H, W) -> A: (C*k*k, N*Ho*Wo); row index = c*k*k + dy*k + dx."""
    C, N, H, W = x_cnhw.shape
    Ho = (H + 2 * pad - ksize) // stride + 1
    Wo = (W + 2 * pad - ksize) // stride + 1
    xp = jnp.pad(x_cnhw, ((0, 0), (0, 0), (pad, pad), (pad, pad)))
    rows = []
    for dy in range(ksize):
        for dx in range(ksize):
            rows.append(xp[:, :,
                           dy:dy + (Ho - 1) * stride + 1:stride,
                           dx:dx + (Wo - 1) * stride + 1:stride])   # (C, N, Ho, Wo)
    p = jnp.stack(rows, axis=1)                                      # (C, k*k, N, Ho, Wo)
    return p.reshape(C * ksize * ksize, N * Ho * Wo), Ho, Wo


# ----------------------------------------------------------------------------
# Parameters (deterministic, synthetic) + one-time layout preparation
# ----------------------------------------------------------------------------
def init_residual_params(key, input_channels, num_channels, use_1x1conv):
    def nxt():
        nonlocal key
        key, sub = jax.random.split(key)
        return sub

    p = {
        "conv1_w": 0.1 * jax.random.normal(nxt(), (num_channels, input_channels, 3, 3), jnp.float32),
        "conv1_b": 0.1 * jax.random.normal(nxt(), (num_channels,), jnp.float32),
        "conv2_w": 0.1 * jax.random.normal(nxt(), (num_channels, num_channels, 3, 3), jnp.float32),
        "conv2_b": 0.1 * jax.random.normal(nxt(), (num_channels,), jnp.float32),
        "bn1_g": 1.0 + 0.1 * jax.random.normal(nxt(), (num_channels,), jnp.float32),
        "bn1_b": 0.1 * jax.random.normal(nxt(), (num_channels,), jnp.float32),
        "bn2_g": 1.0 + 0.1 * jax.random.normal(nxt(), (num_channels,), jnp.float32),
        "bn2_b": 0.1 * jax.random.normal(nxt(), (num_channels,), jnp.float32),
    }
    if use_1x1conv:
        p["conv3_w"] = 0.1 * jax.random.normal(nxt(), (num_channels, input_channels, 1, 1), jnp.float32)
        p["conv3_b"] = 0.1 * jax.random.normal(nxt(), (num_channels,), jnp.float32)
    return p


def prepare_params(p):
    """Hoisted once-per-model weight prep: GEMM layouts + bf16 cast + (C,1) columns."""
    cout = p["conv1_w"].shape[0]
    col = lambda v: v.reshape(cout, 1).astype(jnp.float32)
    q = {
        "w1m": p["conv1_w"].reshape(cout, -1).astype(jnp.bfloat16),
        "b1": col(p["conv1_b"]), "g1": col(p["bn1_g"]), "be1": col(p["bn1_b"]),
        "w2m": p["conv2_w"].reshape(cout, -1).astype(jnp.bfloat16),
        "b2": col(p["conv2_b"]), "g2": col(p["bn2_g"]), "be2": col(p["bn2_b"]),
    }
    if "conv3_w" in p:
        q["w3m"] = p["conv3_w"].reshape(cout, -1).astype(jnp.bfloat16)
        q["b3"] = col(p["conv3_b"])
    return q


# ----------------------------------------------------------------------------
# Forward pass (mirrors Residual.forward)
# ----------------------------------------------------------------------------
def residual_forward(params, x, *, strides=1):
    """x: (N, Cin, H, W) float32 -> (N, Cout, Ho, Wo) float32."""
    N, Cin, H, W = x.shape
    Cout = params["w1m"].shape[0]
    x_cnhw = jnp.transpose(x, (1, 0, 2, 3))                       # (Cin, N, H, W)

    # Y = relu(bn1(conv1(X)))        -- one fused pallas_call
    a1, Ho, Wo = _im2col_cnhw(x_cnhw.astype(jnp.bfloat16), 3, 1, strides)
    y1 = conv_bn_relu(a1, params["w1m"], params["b1"], params["g1"], params["be1"])  # (Cout, M) bf16

    # Y = bn2(conv2(Y)); X = conv3(X) or X; out = relu(Y + X)  -- one fused pallas_call
    a2, _, _ = _im2col_cnhw(y1.reshape(Cout, N, Ho, Wo), 3, 1, 1)
    if "w3m" in params:
        skip = x_cnhw[:, :, ::strides, ::strides].reshape(Cin, N * Ho * Wo).astype(jnp.bfloat16)
        y2 = conv_bn_add_relu(a2, params["w2m"], params["b2"], params["g2"], params["be2"],
                              skip, params["w3m"], params["b3"])
    else:
        # identity skip (module requires Cin == Cout and strides == 1 here)
        skip = x_cnhw.reshape(Cin, N * H * W)
        y2 = conv_bn_add_relu(a2, params["w2m"], params["b2"], params["g2"], params["be2"], skip)

    return jnp.transpose(y2.reshape(Cout, N, Ho, Wo), (1, 0, 2, 3))  # back to NCHW, f32


if __name__ == "__main__":
    key = jax.random.PRNGKey(0)
    k_pa, k_pb, k_x = jax.random.split(key, 3)

    x = jax.random.normal(k_x, (2, 4, 16, 16), jnp.float32)

    # Config A: Residual(4, 8, use_1x1conv=True, strides=2)  -> projection skip path
    params_a = prepare_params(init_residual_params(k_pa, 4, 8, use_1x1conv=True))
    fwd_a = jax.jit(functools.partial(residual_forward, strides=2))
    out_a = jax.block_until_ready(fwd_a(params_a, x))
    assert out_a.shape == (2, 8, 8, 8), out_a.shape
    assert out_a.dtype == jnp.float32

    # Config B: Residual(4, 4, use_1x1conv=False, strides=1) -> identity skip path
    params_b = prepare_params(init_residual_params(k_pb, 4, 4, use_1x1conv=False))
    fwd_b = jax.jit(functools.partial(residual_forward, strides=1))
    out_b = jax.block_until_ready(fwd_b(params_b, x))
    assert out_b.shape == (2, 4, 16, 16), out_b.shape
    assert out_b.dtype == jnp.float32

    print("KERNEL_OK")
</pallas_src>

<mosaic_0001>
module attributes {stable_mosaic.version = 11 : i64} {
  func.func @_conv_bn_relu_kernel(%arg0: memref<36x128xbf16, #tpu.memory_space<vmem>>, %arg1: memref<8x36xbf16, #tpu.memory_space<vmem>>, %arg2: memref<8x1xf32, #tpu.memory_space<vmem>>, %arg3: memref<8x1xf32, #tpu.memory_space<vmem>>, %arg4: memref<8x1xf32, #tpu.memory_space<vmem>>, %arg5: memref<8x128xbf16, #tpu.memory_space<vmem>>) attributes {dimension_semantics = [], scalar_prefetch = 0 : i64, scratch_operands = 0 : i64, tpu.core_type = #tpu.core_type<tc>} {
    %c0 = arith.constant 0 : index
    %c0_0 = arith.constant 0 : index
    %0 = vector.load %arg1[%c0, %c0_0] : memref<8x36xbf16, #tpu.memory_space<vmem>>, vector<8x36xbf16>
    %c0_1 = arith.constant 0 : index
    %c0_2 = arith.constant 0 : index
    %1 = vector.load %arg0[%c0_1, %c0_2] : memref<36x128xbf16, #tpu.memory_space<vmem>>, vector<36x128xbf16>
    %cst = arith.constant dense<0.000000e+00> : vector<8x128xf32>
    %2 = tpu.matmul %0, %1, %cst {dimension_numbers = #tpu.dot_dimension_numbers<[1], [0], [0], [1], [0, 0, 1, 1], [], []>} : vector<8x36xbf16>, vector<36x128xbf16>, vector<8x128xf32> -> vector<8x128xf32>
    %c0_3 = arith.constant 0 : index
    %c0_4 = arith.constant 0 : index
    %3 = vector.load %arg2[%c0_3, %c0_4] : memref<8x1xf32, #tpu.memory_space<vmem>>, vector<8x1xf32>
    %4 = vector.broadcast %3 : vector<8x1xf32> to vector<8x128xf32>
    %5 = arith.addf %2, %4 : vector<8x128xf32>
    %cst_5 = arith.constant dense<0.000000e+00> : vector<8xf32>
    %6 = vector.multi_reduction <add>, %5, %cst_5 [1] : vector<8x128xf32> to vector<8xf32>
    %7 = vector.shape_cast %6 : vector<8xf32> to vector<8x1xf32>
    %cst_6 = arith.constant 1.280000e+02 : f32
    %8 = vector.broadcast %cst_6 : f32 to vector<8x1xf32>
    %9 = arith.divf %7, %8 : vector<8x1xf32>
    %10 = vector.broadcast %9 : vector<8x1xf32> to vector<8x128xf32>
    %11 = arith.subf %5, %10 : vector<8x128xf32>
    %12 = arith.mulf %11, %11 : vector<8x128xf32>
    %cst_7 = arith.constant dense<0.000000e+00> : vector<8xf32>
    %13 = vector.multi_reduction <add>, %12, %cst_7 [1] : vector<8x128xf32> to vector<8xf32>
    %14 = vector.shape_cast %13 : vector<8xf32> to vector<8x1xf32>
    %cst_8 = arith.constant 1.280000e+02 : f32
    %15 = vector.broadcast %cst_8 : f32 to vector<8x1xf32>
    %16 = arith.divf %14, %15 : vector<8x1xf32>
    %17 = vector.broadcast %9 : vector<8x1xf32> to vector<8x128xf32>
    %18 = arith.subf %5, %17 : vector<8x128xf32>
    %cst_9 = arith.constant 9.99999974E-6 : f32
    %19 = vector.broadcast %cst_9 : f32 to vector<8x1xf32>
    %20 = arith.addf %16, %19 : vector<8x1xf32>
    %21 = math.rsqrt %20 : vector<8x1xf32>
    %22 = vector.broadcast %21 : vector<8x1xf32> to vector<8x128xf32>
    %23 = arith.mulf %18, %22 : vector<8x128xf32>
    %c0_10 = arith.constant 0 : index
    %c0_11 = arith.constant 0 : index
    %24 = vector.load %arg3[%c0_10, %c0_11] : memref<8x1xf32, #tpu.memory_space<vmem>>, vector<8x1xf32>
    %25 = vector.broadcast %24 : vector<8x1xf32> to vector<8x128xf32>
    %26 = arith.mulf %23, %25 : vector<8x128xf32>
    %c0_12 = arith.constant 0 : index
    %c0_13 = arith.constant 0 : index
    %27 = vector.load %arg4[%c0_12, %c0_13] : memref<8x1xf32, #tpu.memory_space<vmem>>, vector<8x1xf32>
    %28 = vector.broadcast %27 : vector<8x1xf32> to vector<8x128xf32>
    %29 = arith.addf %26, %28 : vector<8x128xf32>
    %cst_14 = arith.constant 0.000000e+00 : f32
    %30 = vector.broadcast %cst_14 : f32 to vector<8x128xf32>
    %31 = arith.maximumf %29, %30 : vector<8x128xf32>
    %32 = arith.truncf %31 : vector<8x128xf32> to vector<8x128xbf16>
    %c0_15 = arith.constant 0 : index
    %c0_16 = arith.constant 0 : index
    %33 = vector.load %arg5[%c0_15, %c0_16] : memref<8x128xbf16, #tpu.memory_space<vmem>>, vector<8x128xbf16>
    tpu.vector_store %arg5[%c0_15, %c0_16], %32 {strides = array<i32>} : memref<8x128xbf16, #tpu.memory_space<vmem>>, vector<8x128xbf16>,
    return
  }
}

module attributes {stable_mosaic.version = 11 : i64} {
  func.func @_conv_bn_add_relu_proj_kernel(%arg0: memref<72x128xbf16, #tpu.memory_space<vmem>>, %arg1: memref<8x72xbf16, #tpu.memory_space<vmem>>, %arg2: memref<8x1xf32, #tpu.memory_space<vmem>>, %arg3: memref<8x1xf32, #tpu.memory_space<vmem>>, %arg4: memref<8x1xf32, #tpu.memory_space<vmem>>, %arg5: memref<4x128xbf16, #tpu.memory_space<vmem>>, %arg6: memref<8x4xbf16, #tpu.memory_space<vmem>>, %arg7: memref<8x1xf32, #tpu.memory_space<vmem>>, %arg8: memref<8x128xf32, #tpu.memory_space<vmem>>) attributes {dimension_semantics = [], scalar_prefetch = 0 : i64, scratch_operands = 0 : i64, tpu.core_type = #tpu.core_type<tc>} {
    %c0 = arith.constant 0 : index
    %c0_0 = arith.constant 0 : index
    %0 = vector.load %arg1[%c0, %c0_0] : memref<8x72xbf16, #tpu.memory_space<vmem>>, vector<8x72xbf16>
    %c0_1 = arith.constant 0 : index
    %c0_2 = arith.constant 0 : index
    %1 = vector.load %arg0[%c0_1, %c0_2] : memref<72x128xbf16, #tpu.memory_space<vmem>>, vector<72x128xbf16>
    %cst = arith.constant dense<0.000000e+00> : vector<8x128xf32>
    %2 = tpu.matmul %0, %1, %cst {dimension_numbers = #tpu.dot_dimension_numbers<[1], [0], [0], [1], [0, 0, 1, 1], [], []>} : vector<8x72xbf16>, vector<72x128xbf16>, vector<8x128xf32> -> vector<8x128xf32>
    %c0_3 = arith.constant 0 : index
    %c0_4 = arith.constant 0 : index
    %3 = vector.load %arg2[%c0_3, %c0_4] : memref<8x1xf32, #tpu.memory_space<vmem>>, vector<8x1xf32>
    %4 = vector.broadcast %3 : vector<8x1xf32> to vector<8x128xf32>
    %5 = arith.addf %2, %4 : vector<8x128xf32>
    %cst_5 = arith.constant dense<0.000000e+00> : vector<8xf32>
    %6 = vector.multi_reduction <add>, %5, %cst_5 [1] : vector<8x128xf32> to vector<8xf32>
    %7 = vector.shape_cast %6 : vector<8xf32> to vector<8x1xf32>
    %cst_6 = arith.constant 1.280000e+02 : f32
    %8 = vector.broadcast %cst_6 : f32 to vector<8x1xf32>
    %9 = arith.divf %7, %8 : vector<8x1xf32>
    %10 = vector.broadcast %9 : vector<8x1xf32> to vector<8x128xf32>
    %11 = arith.subf %5, %10 : vector<8x128xf32>
    %12 = arith.mulf %11, %11 : vector<8x128xf32>
    %cst_7 = arith.constant dense<0.000000e+00> : vector<8xf32>
    %13 = vector.multi_reduction <add>, %12, %cst_7 [1] : vector<8x128xf32> to vector<8xf32>
    %14 = vector.shape_cast %13 : vector<8xf32> to vector<8x1xf32>
    %cst_8 = arith.constant 1.280000e+02 : f32
    %15 = vector.broadcast %cst_8 : f32 to vector<8x1xf32>
    %16 = arith.divf %14, %15 : vector<8x1xf32>
    %17 = vector.broadcast %9 : vector<8x1xf32> to vector<8x128xf32>
    %18 = arith.subf %5, %17 : vector<8x128xf32>
    %cst_9 = arith.constant 9.99999974E-6 : f32
    %19 = vector.broadcast %cst_9 : f32 to vector<8x1xf32>
    %20 = arith.addf %16, %19 : vector<8x1xf32>
    %21 = math.rsqrt %20 : vector<8x1xf32>
    %22 = vector.broadcast %21 : vector<8x1xf32> to vector<8x128xf32>
    %23 = arith.mulf %18, %22 : vector<8x128xf32>
    %c0_10 = arith.constant 0 : index
    %c0_11 = arith.constant 0 : index
    %24 = vector.load %arg3[%c0_10, %c0_11] : memref<8x1xf32, #tpu.memory_space<vmem>>, vector<8x1xf32>
    %25 = vector.broadcast %24 : vector<8x1xf32> to vector<8x128xf32>
    %26 = arith.mulf %23, %25 : vector<8x128xf32>
    %c0_12 = arith.constant 0 : index
    %c0_13 = arith.constant 0 : index
    %27 = vector.load %arg4[%c0_12, %c0_13] : memref<8x1xf32, #tpu.memory_space<vmem>>, vector<8x1xf32>
    %28 = vector.broadcast %27 : vector<8x1xf32> to vector<8x128xf32>
    %29 = arith.addf %26, %28 : vector<8x128xf32>
    %c0_14 = arith.constant 0 : index
    %c0_15 = arith.constant 0 : index
    %30 = vector.load %arg6[%c0_14, %c0_15] : memref<8x4xbf16, #tpu.memory_space<vmem>>, vector<8x4xbf16>
    %c0_16 = arith.constant 0 : index
    %c0_17 = arith.constant 0 : index
    %31 = vector.load %arg5[%c0_16, %c0_17] : memref<4x128xbf16, #tpu.memory_space<vmem>>, vector<4x128xbf16>
    %cst_18 = arith.constant dense<0.000000e+00> : vector<8x128xf32>
    %32 = tpu.matmul %30, %31, %cst_18 {dimension_numbers = #tpu.dot_dimension_numbers<[1], [0], [0], [1], [0, 0, 1, 1], [], []>} : vector<8x4xbf16>, vector<4x128xbf16>, vector<8x128xf32> -> vector<8x128xf32>
    %c0_19 = arith.constant 0 : index
    %c0_20 = arith.constant 0 : index
    %33 = vector.load %arg7[%c0_19, %c0_20] : memref<8x1xf32, #tpu.memory_space<vmem>>, vector<8x1xf32>
    %34 = vector.broadcast %33 : vector<8x1xf32> to vector<8x128xf32>
    %35 = arith.addf %32, %34 : vector<8x128xf32>
    %36 = arith.addf %29, %35 : vector<8x128xf32>
    %cst_21 = arith.constant 0.000000e+00 : f32
    %37 = vector.broadcast %cst_21 : f32 to vector<8x128xf32>
    %38 = arith.maximumf %36, %37 : vector<8x128xf32>
    %c0_22 = arith.constant 0 : index
    %c0_23 = arith.constant 0 : index
    %39 = vector.load %arg8[%c0_22, %c0_23] : memref<8x128xf32, #tpu.memory_space<vmem>>, vector<8x128xf32>
    tpu.vector_store %arg8[%c0_22, %c0_23], %38 {strides = array<i32>} : memref<8x128xf32, #tpu.memory_space<vmem>>, vector<8x128xf32>,
    return
  }
}

</mosaic_0001>

<bundles_post_ra>
// kernel: residual_forward.2
= control target key start
LH: loop header
LB: loop body
LE: loop exit
PB: predicated region body
PF: predicated region fallthrough
CT: control target
= control target key end

     0   :  { %v157_v0 = vmov 0.0   ;;  %vm158_vm0 = vmmov 0   ;;  %v159_v2 = vmov 0   ;;  %vm52_vm1 = vcmask 1041408   ;;  %s214_s0 = inlined_call_operand.vmem [shape: bf16[36,128], index: 0, kind: input, shape index: {}]   ;;  %s215_s2 = inlined_call_operand.vmem [shape: f32[8,1], index: 2, kind: input, shape index: {}]   ;;  %s216_s1 = inlined_call_operand.vmem [shape: bf16[8,36], index: 1, kind: input, shape index: {}]   ;;  %s217_s3 = inlined_call_operand.vmem [shape: f32[8,1], index: 3, kind: input, shape index: {}]   ;;  %s218_s4 = inlined_call_operand.vmem [shape: f32[8,1], index: 4, kind: input, shape index: {}]   ;;  %s219_s5 = inlined_call_operand.vmem [shape: bf16[8,128], index: 5, kind: output, shape index: {}]  }
   0x1   :  { %137 = vmatprep.subr.bf16.mxu0 %v157_v0  ;;  %v152_v1 = vld [vmem:[%s214_s0] sm:$0xff]   ;;  %143 = vmatprep.mubr.msk.bf16.mxu0 %vm158_vm0, %v157_v0  ;;  %v153_v3 = vld [vmem:[%s214_s0 + $0x8] sm:$0xff]   ;;  %v154_v5 = vld [vmem:[%s214_s0 + $0x10] ss:$0 sps:$4 sm:$0x33]   ;;  %vm48_vm2 = vcmask 293888  }
   0x2   :  { %150 = vset.pattern.permute.xlu0 %v159_v2  ;;  %151 = vset.pattern.permute.xlu1 %v159_v2  ;;  %v27_v4 = vld [vmem:[%s215_s2] sm:$0xff]  ;;  %v54_v6 = vsel %vm52_vm1, %v154_v5, 0 }
   0x3   :  { %138 = vmatpush3.bf16.msra.mxu0 %v152_v1  ;;  %30 = vperm.xlu0 %150, %v27_v4   ;;  %v21_v7 = vld [vmem:[%s216_s1] sm:$0xf] }
   0x4   :  { %139 = vmatprep.subr.bf16.mxu0 %v157_v0  ;;  %v108_v8 = vld [vmem:[%s217_s3] sm:$0xff] }
   0x5   :  { %111 = vperm.xlu1 %151, %v108_v8   ;;  %v115_v19 = vld [vmem:[%s218_s4] sm:$0xff] }
   0x7   :  { %140 = vmatpush3.bf16.msra.mxu0 %v153_v3 }
   0x8   :  { %141 = vmatprep.subr.bf16.mxu0 %v157_v0 }
   0xb   :  { %142 = vmatpush3.bf16.msra.mxu0 %v54_v6 }
   0xe   :  { %144 = vmatmul.mubr.msk.bf16.vlgmr.msra.gmra.mrb[0].mxu0 %vm48_vm2, %v21_v7 }
  0x82   :  { %v31_v9 = vpop.permute.xlu0 %30 }
  0x84   :  { %v112_v20 = vpop.permute.xlu1 %111 }
  0xe1   :  { %v90_v10 = vpop.f32.mrb[0].mxu0 }
  0xe2   :  { %v91_v11 = vadd.f32 %v90_v10, %v31_v9  ;;  %v145_v12 = vpop.f32.mrb[1].mxu0 }
  0xe3   :  { %v93_v13 = vpop.f32.mrb[2].mxu0 }
  0xe4   :  { %96 = vadd.xlane.f32.xlu0 %v91_v11  ;;  %v146_v14 = vpop.f32.mrb[3].mxu0 }
 0x171   :  { %v97_v15 = vpop.xlane.xlu0 %96 }
 0x172   :  { %v99_v16 = vmul.f32 0.0078125, %v97_v15 }
 0x174   :  { %v100_v17 = vsub.f32 %v91_v11, %v99_v16 }
 0x176   :  { %v101_v18 = vmul.f32 %v100_v17, %v100_v17 }
 0x178   :  { %102 = vadd.xlane.f32.xlu1 %v101_v18 }
 0x189   :  { %118 = vperm.xlu1 %151, %v115_v19  }
 0x205   :  { %v103_v21 = vpop.xlane.xlu1 %102 }
 0x206   :  { %v104_v22 = vmul.f32 0.0078125, %v103_v21 }
 0x208   :  { %v105_v23 = vadd.f32 1e-05, %v104_v22 }
 0x209   :  { %v119_v27 = vpop.permute.xlu1 %118 }
 0x20a   :  { %155 = vrsqrt.f32 %v105_v23 }
 0x214   :  { %v156_v24 = vpop.eup %155 }
 0x215   :  { %v107_v25 = vmul.f32 %v156_v24, %v100_v17 }
 0x217   :  { %v114_v26 = vmul.f32 %v112_v20, %v107_v25 }
 0x219   :  { %v121_v28 = vadd.f32 %v119_v27, %v114_v26 }
 0x21b   :  { %v122_v29 = vmax.f32 %v121_v28, 0.0 }
 0x21d   :  { %v123_v30 = vpack.c.bf16 %v122_v29, %v122_v29 }
 0x21f   :  { %124 = vst [vmem:[%s219_s5] sm:$0xf] %v123_v30 }

// kernel: residual_forward.3
= control target key start
LH: loop header
LB: loop body
LE: loop exit
PB: predicated region body
PF: predicated region fallthrough
CT: control target
= control target key end

     0   :  { %v257_v0 = vmov 0.0   ;;  %vm258_vm0 = vmmov 0   ;;  %v259_v2 = vmov 0   ;;  %vm77_vm1 = vcmask 1043456   ;;  %s344_s0 = inlined_call_operand.vmem [shape: bf16[72,128], index: 0, kind: input, shape index: {}]   ;;  %s345_s2 = inlined_call_operand.vmem [shape: f32[8,1], index: 2, kind: input, shape index: {}]   ;;  %s346_s1 = inlined_call_operand.vmem [shape: bf16[8,72], index: 1, kind: input, shape index: {}]   ;;  %s347_s5 = inlined_call_operand.vmem [shape: bf16[4,128], index: 5, kind: input, shape index: {}]   ;;  %s348_s6 = inlined_call_operand.vmem [shape: bf16[8,4], index: 6, kind: input, shape index: {}]   ;;  %s349_s3 = inlined_call_operand.vmem [shape: f32[8,1], index: 3, kind: input, shape index: {}]   ;;  %s350_s4 = inlined_call_operand.vmem [shape: f32[8,1], index: 4, kind: input, shape index: {}]   ;;  %s351_s7 = inlined_call_operand.vmem [shape: f32[8,1], index: 7, kind: input, shape index: {}]   ;;  %s352_s8 = inlined_call_operand.vmem [shape: f32[8,128], index: 8, kind: output, shape index: {}]  }
   0x1   :  { %225 = vmatprep.subr.bf16.mxu0 %v257_v0  ;;  %v250_v1 = vld [vmem:[%s344_s0] sm:$0xff]   ;;  %235 = vmatprep.mubr.msk.bf16.mxu0 %vm258_vm0, %v257_v0  ;;  %v251_v3 = vld [vmem:[%s344_s0 + $0x8] sm:$0xff]   ;;  %v252_v5 = vld [vmem:[%s344_s0 + $0x10] sm:$0xff]   ;;  %vm73_vm2 = vcmask 588800   ;;  %vm159_vm3 = vcmask 1041408   ;;  %vm155_vm4 = vcmask 31744  }
   0x2   :  { %248 = vset.pattern.permute.xlu0 %v259_v2  ;;  %239 = vmatprep.subr.bf16.mxu1 %v257_v0  ;;  %v40_v4 = vld [vmem:[%s345_s2] sm:$0xff]  ;;  %v253_v6 = vld [vmem:[%s344_s0 + $0x18] sm:$0xff]  }
   0x3   :  { %226 = vmatpush3.bf16.msra.mxu0 %v250_v1  ;;  %241 = vmatprep.mubr.msk.bf16.mxu1 %vm258_vm0, %v257_v0  ;;  %v254_v7 = vld [vmem:[%s344_s0 + $0x20] ss:$0 sps:$4 sm:$0xff]  }
   0x4   :  { %227 = vmatprep.subr.bf16.mxu0 %v257_v0  ;;  %249 = vset.pattern.permute.xlu1 %v259_v2  ;;  %v79_v8 = vsel %vm77_vm1, %v254_v7, 0  ;;  %v30_v9 = vld [vmem:[%s346_s1] sm:$0xf] }
   0x5   :  { %43 = vperm.xlu0 %248, %v40_v4   ;;  %v148_v10 = vld [vmem:[%s347_s5] sm:$0x3] }
   0x6   :  { %v133_v11 = vld [vmem:[%s349_s3] sm:$0xff]  ;;  %v161_v12 = vsel %vm159_vm3, %v148_v10, 0 }
   0x7   :  { %228 = vmatpush3.bf16.msra.mxu0 %v251_v3  ;;  %136 = vperm.xlu1 %249, %v133_v11   ;;  %v147_v13 = vld [vmem:[%s348_s6] sm:$0xf] }
   0x8   :  { %229 = vmatprep.subr.bf16.mxu0 %v257_v0  ;;  %240 = vmatpush3.bf16.msra.mxu1 %v161_v12  ;;  %v140_v14 = vld [vmem:[%s350_s4] sm:$0xff] }
   0x9   :  { %v149_v25 = vld [vmem:[%s351_s7] sm:$0xff] }
   0xb   :  { %230 = vmatpush3.bf16.msra.mxu0 %v252_v5  ;;  %242 = vmatmul.mubr.msk.bf16.vlgmr.msra.gmra.mrb[0].mxu1 %vm155_vm4, %v147_v13 }
   0xc   :  { %231 = vmatprep.subr.bf16.mxu0 %v257_v0  ;;  %143 = vperm.xlu1 %249, %v140_v14  }
   0xf   :  { %232 = vmatpush3.bf16.msra.mxu0 %v253_v6 }
  0x10   :  { %233 = vmatprep.subr.bf16.mxu0 %v257_v0 }
  0x13   :  { %234 = vmatpush3.bf16.msra.mxu0 %v79_v8 }
  0x16   :  { %236 = vmatmul.mubr.msk.bf16.vlgmr.msra.gmra.mrb[0].mxu0 %vm73_vm2, %v30_v9 }
  0x84   :  { %v44_v15 = vpop.permute.xlu0 %43 }
  0x86   :  { %v137_v30 = vpop.permute.xlu1 %136 }
  0x8b   :  { %v144_v31 = vpop.permute.xlu1 %143 }
  0xde   :  { %v197_v26 = vpop.f32.mrb[0].mxu1 }
  0xdf   :  { %v243_v27 = vpop.f32.mrb[1].mxu1 }
  0xe0   :  { %v200_v28 = vpop.f32.mrb[2].mxu1 }
  0xe1   :  { %v244_v29 = vpop.f32.mrb[3].mxu1 }
  0xe9   :  { %v115_v16 = vpop.f32.mrb[0].mxu0 }
  0xea   :  { %v116_v17 = vadd.f32 %v115_v16, %v44_v15  ;;  %v237_v18 = vpop.f32.mrb[1].mxu0 }
  0xeb   :  { %v118_v19 = vpop.f32.mrb[2].mxu0 }
  0xec   :  { %121 = vadd.xlane.f32.xlu0 %v116_v17  ;;  %v238_v20 = vpop.f32.mrb[3].mxu0 }
 0x179   :  { %v122_v21 = vpop.xlane.xlu0 %121 }
 0x17a   :  { %v124_v22 = vmul.f32 0.0078125, %v122_v21 }
 0x17c   :  { %v125_v23 = vsub.f32 %v116_v17, %v124_v22 }
 0x17e   :  { %v126_v24 = vmul.f32 %v125_v23, %v125_v23 }
 0x180   :  { %127 = vadd.xlane.f32.xlu1 %v126_v24 }
 0x191   :  { %152 = vperm.xlu1 %249, %v149_v25  }
 0x20d   :  { %v128_v32 = vpop.xlane.xlu1 %127 }
 0x20e   :  { %v129_v33 = vmul.f32 0.0078125, %v128_v32 }
 0x210   :  { %v130_v34 = vadd.f32 1e-05, %v129_v33 }
 0x211   :  { %v153_v37 = vpop.permute.xlu1 %152 }
 0x212   :  { %255 = vrsqrt.f32 %v130_v34  ;;  %v198_v40 = vadd.f32 %v197_v26, %v153_v37 }
 0x21c   :  { %v256_v35 = vpop.eup %255 }
 0x21d   :  { %v132_v36 = vmul.f32 %v256_v35, %v125_v23 }
 0x21f   :  { %v139_v38 = vmul.f32 %v137_v30, %v132_v36 }
 0x221   :  { %v146_v39 = vadd.f32 %v144_v31, %v139_v38 }
 0x223   :  { %v203_v41 = vadd.f32 %v198_v40, %v146_v39 }
 0x225   :  { %v204_v42 = vmax.f32 %v203_v41, 0.0 }
 0x227   :  { %205 = vst [vmem:[%s352_s8] sm:$0xff] %v204_v42 }

</bundles_post_ra>
